<compile_context>
chip_gen: v7x
topology: tpu7x:2x2x1
jax: 0.10.0
libtpu: 0.0.40
codegen_flags: <defaults>
</compile_context>

<pallas_src>
import jax
import jax.numpy as jnp
from jax import lax
from jax.experimental import pallas as pl
from jax.experimental.pallas import tpu as pltpu


def _make_kernel(shifts, seq_len, dim, tile_nout):
    segments = len(shifts)
    feats = dim // segments
    any_shift = any(a != 0 for a in shifts)
    N = seq_len

    def kernel(x_ref, m_ref, w_ref, b_ref, o_ref, xs_ref):
        # x_ref : (1, N, D)        mxu_dtype
        # m_ref : (1, N, 1)        mxu_dtype ({0, 1})
        # w_ref : (D, tile_nout)   mxu_dtype
        # b_ref : (1, tile_nout)   f32
        # o_ref : (1, N, tile_nout) out dtype
        # xs_ref: (N, D)           mxu_dtype scratch — the assembled shifted x.
        j = pl.program_id(1)

        # Assemble the shifted tensor once per batch (j == 0 on the inner,
        # "arbitrary" output-column axis).  Every j reuses it for one K=D dot,
        # so the mask/roll/where work is not recomputed per column tile and
        # there is no live jnp accumulator to spill.
        @pl.when(j == 0)
        def _assemble():
            if any_shift:
                # Hoisted once for all shifted segments (JAX does not CSE
                # broadcasts / iotas).
                m_b = jnp.broadcast_to(m_ref[0], (N, feats))            # (N, feats)
                row = lax.broadcasted_iota(jnp.int32, (N, feats), 0)    # row index
            for s in range(segments):
                a = shifts[s]
                lo = s * feats
                if a == 0:
                    # PyTorch `shift` returns t untouched (mask NOT applied).
                    xs_ref[:, lo:lo + feats] = x_ref[0, :, lo:lo + feats]
                else:
                    # masked_fill(~mask, 0.) in mxu_dtype (exact for {0,1}),
                    # then F.pad(t, (0,0,a,-a)): out[i] = seg[i - a]
                    #   == roll along seq (XLU) + zero the wrapped rows.
                    seg = x_ref[0, :, lo:lo + feats] * m_b
                    seg = pltpu.roll(seg, shift=a % N, axis=0)
                    if a > 0:
                        seg = jnp.where(row >= a, seg, 0.0)
                    else:
                        seg = jnp.where(row < N + a, seg, 0.0)
                    xs_ref[:, lo:lo + feats] = seg
            rest_lo = segments * feats
            if rest_lo < dim:
                # "rest" feature chunks pass through unchanged.
                xs_ref[:, rest_lo:dim] = x_ref[0, :, rest_lo:dim]

        # Single MXU matmul per grid step; accumulation stays in f32 inside the
        # matmul (no (N, tile_nout) f32 value carried across a Python loop).
        acc = jnp.dot(xs_ref[...], w_ref[...], preferred_element_type=jnp.float32)
        o_ref[0] = (acc + b_ref[...]).astype(o_ref.dtype)

    return kernel


def pre_shift_tokens_linear(x, mask, shifts, W, b, *, mxu_dtype=None):
    """x: (B, N, D), mask: (B, N) bool or None, W: (D, D), b: (D,).

    mxu_dtype: dtype fed to the MXU (e.g. jnp.bfloat16 on v6e/v7x).  x / mask / W
    are cast in the wrapper (mask multiply and zero-fill are exact in bf16);
    accumulation is always f32; output keeps x's original dtype.
    """
    B, N, D = x.shape
    shifts = tuple(int(a) for a in shifts)
    assert len(shifts) >= 1 and D // len(shifts) >= 1
    assert all(abs(a) < N for a in shifts)

    out_dtype = x.dtype
    if mxu_dtype is None:
        mxu_dtype = x.dtype
    if mask is None:
        mask = jnp.ones((B, N), dtype=bool)

    # Lane-dense tiling of W / bias / output over output columns.
    # TODO(synk): make tile_nout generation-aware (128 on v5e's 4x128^2 MXU).
    if D % 256 == 0 and D > 256:
        tile_nout = 256
    elif D % 128 == 0 and D > 128:
        tile_nout = 128
    else:
        tile_nout = D
    nj = D // tile_nout

    # Wrapper-side casts: halve x DMA / VMEM on the bf16 path, bit-identical to
    # casting per-segment inside the kernel (mask is {0,1}).
    x_in = x.astype(mxu_dtype)
    mask_f = mask.astype(mxu_dtype).reshape(B, N, 1)
    W_in = W.astype(mxu_dtype)
    b2 = b.reshape(1, D).astype(jnp.float32)

    kernel = _make_kernel(shifts, N, D, tile_nout)

    # VMEM budget: double-buffered pipeline tiles + single-buffered scratch.
    # The (1, N, 1) mask block pads its lane dim to 128; bias pads sublanes to 8.
    esz = jnp.dtype(mxu_dtype).itemsize
    osz = jnp.dtype(out_dtype).itemsize
    est = (2 * N * D * esz               # x tile
           + 2 * N * 128 * esz           # mask tile (lane-padded)
           + 2 * D * tile_nout * esz     # W column tile
           + 2 * 8 * tile_nout * 4       # bias tile (sublane-padded, f32)
           + 2 * N * tile_nout * osz     # out tile
           + N * D * esz)                # assembled-x scratch
    try:
        phys_vmem = int(pltpu.get_tpu_info().vmem_capacity_bytes)
    except Exception:
        phys_vmem = 64 * 1024 * 1024     # v7x-safe fallback
    vmem_limit = int(min(3 * phys_vmem // 4,
                         max(est + est // 4, 16 * 1024 * 1024)))

    cost = pl.CostEstimate(
        flops=2 * B * N * D * D,
        transcendentals=0,
        bytes_accessed=(B * N * D * esz        # x
                        + B * N * esz          # mask
                        + B * D * D * esz      # W (re-fetched per batch when nj>1)
                        + B * N * D * osz))    # out

    # TODO(synk): when nj == 1, W/bias blocks are grid-invariant and could be
    # single-buffered via pipeline_mode=pl.Buffered(1) to save one W buffer.
    return pl.pallas_call(
        kernel,
        out_shape=jax.ShapeDtypeStruct((B, N, D), out_dtype),
        grid_spec=pltpu.PrefetchScalarGridSpec(
            num_scalar_prefetch=0,
            grid=(B, nj),                                              # j inner
            in_specs=[
                pl.BlockSpec((1, N, D), lambda bi, j: (bi, 0, 0)),     # x
                pl.BlockSpec((1, N, 1), lambda bi, j: (bi, 0, 0)),     # mask
                pl.BlockSpec((D, tile_nout), lambda bi, j: (0, j)),    # W cols
                pl.BlockSpec((1, tile_nout), lambda bi, j: (0, j)),    # bias
            ],
            out_specs=pl.BlockSpec((1, N, tile_nout), lambda bi, j: (bi, 0, j)),
            scratch_shapes=[pltpu.VMEM((N, D), mxu_dtype)],
        ),
        compiler_params=pltpu.CompilerParams(
            dimension_semantics=("parallel", "arbitrary"),
            vmem_limit_bytes=vmem_limit),
        cost_estimate=cost,
    )(x_in, mask_f, W_in, b2)


def reference(x, mask, shifts, W, b):
    """Pure-JAX transcription of PreShiftTokens.forward with fn = Linear."""
    B, N, D = x.shape
    segments = len(shifts)
    feats = D // segments
    n_chunks = D // feats + (1 if D % feats else 0)
    chunks = [x[..., i * feats:(i + 1) * feats] for i in range(n_chunks)]
    to_shift, rest = chunks[:segments], chunks[segments:]
    out_segs = []
    for seg, a in zip(to_shift, shifts):
        if a == 0:
            out_segs.append(seg)
            continue
        s = seg * mask.astype(seg.dtype)[..., None]
        if a > 0:
            s = jnp.concatenate(
                [jnp.zeros_like(s[:, :a]), s[:, :N - a]], axis=1)
        else:
            s = jnp.concatenate(
                [s[:, -a:], jnp.zeros_like(s[:, :(-a)])], axis=1)
        out_segs.append(s)
    xs = jnp.concatenate(out_segs + rest, axis=-1)
    y = jnp.einsum('bnd,de->bne', xs, W, precision=lax.Precision.HIGHEST)
    return y + b[None, None, :]


if __name__ == "__main__":
    def run_case(B, N, D, shifts, mxu_dtype, atol, rtol):
        key = jax.random.PRNGKey(0)
        kx, km, kw, kb = jax.random.split(key, 4)
        x = jax.random.normal(kx, (B, N, D), dtype=jnp.float32)
        mask = jax.random.bernoulli(km, 0.8, (B, N))
        W = jax.random.normal(kw, (D, D), dtype=jnp.float32) * 0.1
        b = jax.random.normal(kb, (D,), dtype=jnp.float32) * 0.1

        out = pre_shift_tokens_linear(x, mask, shifts, W, b,
                                      mxu_dtype=mxu_dtype)
        out = jax.block_until_ready(out)

        want = reference(x, mask, shifts, W, b)
        assert out.shape == want.shape and out.dtype == want.dtype
        err = float(jnp.max(jnp.abs(out - want)))
        assert jnp.allclose(out, want, atol=atol, rtol=rtol), err

    # f32 path: 4 segments of 8 features, positive / negative / zero shifts.
    run_case(2, 8, 32, (0, 1, -1, 2), None, 2e-2, 2e-2)
    # "rest" pass-through chunk (D not a multiple of the segment width).
    run_case(2, 8, 34, (0, 1, -1, 2), None, 2e-2, 2e-2)
    # nj > 1: exercises the j==0 scratch assembly + per-column-tile matmul.
    run_case(2, 8, 256, (0, 1, -1, 2), None, 5e-2, 5e-2)
    # bf16 MXU inputs (v6e/v7x fast path), compared loosely to the f32 reference.
    run_case(2, 8, 32, (0, 1, -1, 2), jnp.bfloat16, 1.5e-1, 1.5e-1)

    print("KERNEL_OK")
</pallas_src>

<mosaic_0001>
module attributes {stable_mosaic.version = 11 : i64} {
  func.func @kernel(%arg0: i32, %arg1: i32, %arg2: memref<1x8x32xf32, #tpu.memory_space<vmem>>, %arg3: memref<1x8x1xf32, #tpu.memory_space<vmem>>, %arg4: memref<32x32xf32, #tpu.memory_space<vmem>>, %arg5: memref<1x32xf32, #tpu.memory_space<vmem>>, %arg6: memref<1x8x32xf32, #tpu.memory_space<vmem>>, %arg7: memref<8x32xf32, #tpu.memory_space<vmem>>) attributes {dimension_semantics = [#tpu.dimension_semantics<parallel>, #tpu.dimension_semantics<arbitrary>], iteration_bounds = array<i64: 2, 1>, scalar_prefetch = 0 : i64, scratch_operands = 1 : i64, tpu.core_type = #tpu.core_type<tc>, window_params = [{transform_indices = @transform_0, window_bounds = array<i64: 1, 8, 32>}, {transform_indices = @transform_1, window_bounds = array<i64: 1, 8, 1>}, {transform_indices = @transform_2, window_bounds = array<i64: 32, 32>}, {transform_indices = @transform_3, window_bounds = array<i64: 1, 32>}, {transform_indices = @transform_4, window_bounds = array<i64: 1, 8, 32>}]} {
    %c0_i32 = arith.constant 0 : i32
    %0 = arith.cmpi eq, %arg1, %c0_i32 : i32
    %1 = arith.extui %0 : i1 to i32
    %c0_i32_0 = arith.constant 0 : i32
    %2 = arith.cmpi ne, %1, %c0_i32_0 : i32
    scf.if %2 {
      %c0_9 = arith.constant 0 : index
      %c0_10 = arith.constant 0 : index
      %c0_11 = arith.constant 0 : index
      %12 = vector.load %arg3[%c0_9, %c0_10, %c0_11] : memref<1x8x1xf32, #tpu.memory_space<vmem>>, vector<1x8x1xf32>
      %13 = vector.shape_cast %12 : vector<1x8x1xf32> to vector<8x1xf32>
      %14 = vector.shape_cast %13 : vector<8x1xf32> to vector<8x1xf32>
      %15 = vector.broadcast %14 : vector<8x1xf32> to vector<8x8xf32>
      %16 = tpu.iota {dimensions = array<i32: 0>} : vector<8x8xi32>
      %c0_12 = arith.constant 0 : index
      %c0_13 = arith.constant 0 : index
      %c0_14 = arith.constant 0 : index
      %17 = vector.load %arg2[%c0_12, %c0_13, %c0_14] : memref<1x8x32xf32, #tpu.memory_space<vmem>>, vector<1x8x8xf32>
      %18 = vector.shape_cast %17 : vector<1x8x8xf32> to vector<8x8xf32>
      %c0_15 = arith.constant 0 : index
      %c0_16 = arith.constant 0 : index
      %19 = vector.load %arg7[%c0_15, %c0_16] : memref<8x32xf32, #tpu.memory_space<vmem>>, vector<8x8xf32>
      tpu.vector_store %arg7[%c0_15, %c0_16], %18 {strides = array<i32>} : memref<8x32xf32, #tpu.memory_space<vmem>>, vector<8x8xf32>,
      %c0_17 = arith.constant 0 : index
      %c0_18 = arith.constant 0 : index
      %c8 = arith.constant 8 : index
      %20 = vector.load %arg2[%c0_17, %c0_18, %c8] : memref<1x8x32xf32, #tpu.memory_space<vmem>>, vector<1x8x8xf32>
      %21 = vector.shape_cast %20 : vector<1x8x8xf32> to vector<8x8xf32>
      %22 = arith.mulf %21, %15 : vector<8x8xf32>
      %c1_i32 = arith.constant 1 : i32
      %23 = tpu.dynamic_rotate %22 by %c1_i32 dim 0 : vector<8x8xf32>, i32 -> vector<8x8xf32>
      %c1_i32_19 = arith.constant 1 : i32
      %24 = vector.broadcast %c1_i32_19 : i32 to vector<8x8xi32>
      %25 = arith.cmpi sge, %16, %24 : vector<8x8xi32>
      %cst_20 = arith.constant 0.000000e+00 : f32
      %26 = vector.broadcast %cst_20 : f32 to vector<8x8xf32>
      %27 = arith.select %25, %23, %26 : vector<8x8xi1>, vector<8x8xf32>
      %c0_21 = arith.constant 0 : index
      %c8_22 = arith.constant 8 : index
      %28 = vector.load %arg7[%c0_21, %c8_22] : memref<8x32xf32, #tpu.memory_space<vmem>>, vector<8x8xf32>
      tpu.vector_store %arg7[%c0_21, %c8_22], %27 {strides = array<i32>} : memref<8x32xf32, #tpu.memory_space<vmem>>, vector<8x8xf32>,
      %c0_23 = arith.constant 0 : index
      %c0_24 = arith.constant 0 : index
      %c16 = arith.constant 16 : index
      %29 = vector.load %arg2[%c0_23, %c0_24, %c16] : memref<1x8x32xf32, #tpu.memory_space<vmem>>, vector<1x8x8xf32>
      %30 = vector.shape_cast %29 : vector<1x8x8xf32> to vector<8x8xf32>
      %31 = arith.mulf %30, %15 : vector<8x8xf32>
      %c7_i32 = arith.constant 7 : i32
      %32 = tpu.dynamic_rotate %31 by %c7_i32 dim 0 : vector<8x8xf32>, i32 -> vector<8x8xf32>
      %c7_i32_25 = arith.constant 7 : i32
      %33 = vector.broadcast %c7_i32_25 : i32 to vector<8x8xi32>
      %34 = arith.cmpi slt, %16, %33 : vector<8x8xi32>
      %cst_26 = arith.constant 0.000000e+00 : f32
      %35 = vector.broadcast %cst_26 : f32 to vector<8x8xf32>
      %36 = arith.select %34, %32, %35 : vector<8x8xi1>, vector<8x8xf32>
      %c0_27 = arith.constant 0 : index
      %c16_28 = arith.constant 16 : index
      %37 = vector.load %arg7[%c0_27, %c16_28] : memref<8x32xf32, #tpu.memory_space<vmem>>, vector<8x8xf32>
      tpu.vector_store %arg7[%c0_27, %c16_28], %36 {strides = array<i32>} : memref<8x32xf32, #tpu.memory_space<vmem>>, vector<8x8xf32>,
      %c0_29 = arith.constant 0 : index
      %c0_30 = arith.constant 0 : index
      %c24 = arith.constant 24 : index
      %38 = vector.load %arg2[%c0_29, %c0_30, %c24] : memref<1x8x32xf32, #tpu.memory_space<vmem>>, vector<1x8x8xf32>
      %39 = vector.shape_cast %38 : vector<1x8x8xf32> to vector<8x8xf32>
      %40 = arith.mulf %39, %15 : vector<8x8xf32>
      %c2_i32 = arith.constant 2 : i32
      %41 = tpu.dynamic_rotate %40 by %c2_i32 dim 0 : vector<8x8xf32>, i32 -> vector<8x8xf32>
      %c2_i32_31 = arith.constant 2 : i32
      %42 = vector.broadcast %c2_i32_31 : i32 to vector<8x8xi32>
      %43 = arith.cmpi sge, %16, %42 : vector<8x8xi32>
      %cst_32 = arith.constant 0.000000e+00 : f32
      %44 = vector.broadcast %cst_32 : f32 to vector<8x8xf32>
      %45 = arith.select %43, %41, %44 : vector<8x8xi1>, vector<8x8xf32>
      %c0_33 = arith.constant 0 : index
      %c24_34 = arith.constant 24 : index
      %46 = vector.load %arg7[%c0_33, %c24_34] : memref<8x32xf32, #tpu.memory_space<vmem>>, vector<8x8xf32>
      tpu.vector_store %arg7[%c0_33, %c24_34], %45 {strides = array<i32>} : memref<8x32xf32, #tpu.memory_space<vmem>>, vector<8x8xf32>,
    } else {
    }
    %c0 = arith.constant 0 : index
    %c0_1 = arith.constant 0 : index
    %3 = vector.load %arg7[%c0, %c0_1] : memref<8x32xf32, #tpu.memory_space<vmem>>, vector<8x32xf32>
    %c0_2 = arith.constant 0 : index
    %c0_3 = arith.constant 0 : index
    %4 = vector.load %arg4[%c0_2, %c0_3] : memref<32x32xf32, #tpu.memory_space<vmem>>, vector<32x32xf32>
    %cst = arith.constant dense<0.000000e+00> : vector<8x32xf32>
    %5 = tpu.matmul %3, %4, %cst {dimension_numbers = #tpu.dot_dimension_numbers<[1], [0], [0], [1], [0, 0, 1, 1], [], []>} : vector<8x32xf32>, vector<32x32xf32>, vector<8x32xf32> -> vector<8x32xf32>
    %c0_4 = arith.constant 0 : index
    %c0_5 = arith.constant 0 : index
    %6 = vector.load %arg5[%c0_4, %c0_5] : memref<1x32xf32, #tpu.memory_space<vmem>>, vector<1x32xf32>
    %7 = vector.broadcast %6 : vector<1x32xf32> to vector<8x32xf32>
    %8 = arith.addf %5, %7 : vector<8x32xf32>
    %c0_6 = arith.constant 0 : index
    %c0_7 = arith.constant 0 : index
    %c0_8 = arith.constant 0 : index
    %9 = vector.load %arg6[%c0_6, %c0_7, %c0_8] : memref<1x8x32xf32, #tpu.memory_space<vmem>>, vector<1x8x32xf32>
    %10 = vector.shape_cast %9 : vector<1x8x32xf32> to vector<8x32xf32>
    %11 = vector.shape_cast %8 : vector<8x32xf32> to vector<1x8x32xf32>
    tpu.vector_store %arg6[%c0_6, %c0_7, %c0_8], %11 {strides = array<i32>} : memref<1x8x32xf32, #tpu.memory_space<vmem>>, vector<1x8x32xf32>,
    return
  }
  func.func @transform_0(%arg0: i32, %arg1: i32) -> (i32, i32, i32) {
    %c0_i32 = arith.constant 0 : i32
    %c0_i32_0 = arith.constant 0 : i32
    %c0_i32_1 = arith.constant 0 : i32
    return %arg0, %c0_i32, %c0_i32_0 : i32, i32, i32
  }
  func.func @transform_1(%arg0: i32, %arg1: i32) -> (i32, i32, i32) {
    %c0_i32 = arith.constant 0 : i32
    %c0_i32_0 = arith.constant 0 : i32
    %c0_i32_1 = arith.constant 0 : i32
    return %arg0, %c0_i32, %c0_i32_0 : i32, i32, i32
  }
  func.func @transform_2(%arg0: i32, %arg1: i32) -> (i32, i32) {
    %c0_i32 = arith.constant 0 : i32
    %c0_i32_0 = arith.constant 0 : i32
    return %c0_i32, %arg1 : i32, i32
  }
  func.func @transform_3(%arg0: i32, %arg1: i32) -> (i32, i32) {
    %c0_i32 = arith.constant 0 : i32
    %c0_i32_0 = arith.constant 0 : i32
    return %c0_i32, %arg1 : i32, i32
  }
  func.func @transform_4(%arg0: i32, %arg1: i32) -> (i32, i32, i32) {
    %c0_i32 = arith.constant 0 : i32
    %c0_i32_0 = arith.constant 0 : i32
    return %arg0, %c0_i32, %arg1 : i32, i32, i32
  }
}

</mosaic_0001>

<bundles_post_ra>
// kernel: tpu_custom_call.1
= control target key start
LH: loop header
LB: loop body
LE: loop exit
PB: predicated region body
PF: predicated region fallthrough
CT: control target
= control target key end

     0   :  { %9 = vsyncpa [#allocation4], 0  ;;  %s953_s0 = inlined_call_operand.vmem [shape: f32[2,8,32], index: 0, kind: input, shape index: {}]   ;;  %s954_s1 = inlined_call_operand.vmem [shape: f32[2,8,1], index: 1, kind: input, shape index: {}]   ;;  %s955_s2 = inlined_call_operand.hbm [shape: f32[32,32], index: 2, kind: input, shape index: {}]   ;;  %s956_s3 = inlined_call_operand.vmem [shape: f32[1,32], index: 3, kind: input, shape index: {}]   ;;  %s957_s4 = inlined_call_operand.hbm [shape: f32[2,8,32], index: 4, kind: output, shape index: {}]  }
   0x1   :  { %10 = vsyncpa [#allocation5], 0 }
   0x2   :  { %12 = vsyncpa [#allocation5 + $0x1], 0  ;;  %s797_s15 = smov 0   ;;  %s799_s16 = smov 0  }
   0x3   :  { %s801_s17 = smov 0   ;;  %s803_s18 = smov 0  }
   0x4   :  { %s805_s19 = smov 0   ;;  %s807_s20 = smov 0  }
   0x5 LB: > { %s528_s21 = sadd.s32 4294967295, %s756_s20   ;;  %s529_s22 = sadd.s32 4294967294, %s756_s20   ;;  %s756_s20 = sphi %s807_s20, %s18_s20   ;;  %s752_s19 = sphi %s805_s19, %s975_s19   ;;  %s748_s18 = sphi %s803_s18, %s974_s18   ;;  %s744_s17 = sphi %s801_s17, %s973_s17   ;;  %s740_s16 = sphi %s799_s16, %s972_s16   ;;  %s736_s15 = sphi %s797_s15, %s971_s15  }
   0x6   : > { %s30_s23 = sadd.s32 1, %s752_s19  ;;  %s143_s24 = sadd.s32 1, %s744_s17 }
   0x7   : > { %p32_p0 = scmp.ge.s32.totalorder %s30_s23, 2  ;;  %p153_p1 = scmp.ne.s32.totalorder %s744_s17, %s740_s16 }
   0x8   : > { %p154_p2 = scmp.eq.s32.totalorder %s528_s21, 1  ;;  %p159_p3 = scmp.ne.s32.totalorder %s740_s16, %s736_s15 }
   0x9   : > { %s977_s23 = smov (%p32_p0, %s30_s23), 0  ;;  %p160_p5 = scmp.eq.s32.totalorder %s529_s22, 1 }
   0xa   : > { %p837_p4 = por %p154_p2, %p153_p1  ;;  %s138_s26 = ssub.s32 %s752_s19, %s977_s23 }
   0xb   : > { %p530_p6 = scmp.ge.s32.totalorder %s756_s20, 1  ;;  %p141_p7 = scmp.eq.s32.totalorder %s138_s26, 0 }
   0xc   : > { %s962_s25 = scalar_select %p837_p4, 1, 0 }
   0xd   : > { %p844_p8 = por %p160_p5, %p159_p3  ;;  %p167_p9 = scmp.lt.s32.totalorder %s756_s20, 3 }
   0xe   : > { %s850_s28 = scalar_select %p141_p7, %s744_s17, %s143_s24  }
   0xf   : > { %s963_s27 = scalar_select %p844_p8, 1, 0 }
  0x10   : > { %p852_p10 = pnand %p530_p6, %p167_p9  ;;  %p856_p11 = scmp.eq.s32.totalorder %s528_s21, 0 }
  0x11   : > { %s758_s5 = smov [#allocation3]   ;;  %s646_s10 = scalar_lea.hbm %s955_s2, 512 }
  0x12   : > { %s964_s29 = scalar_select %p852_p10, 1, 0 }
  0x13   : > { %s965_s30 = scalar_select %p856_p11, 1, 0 }
  0x14   : > { %p573_p12 = pneg %p852_p10  ;;  %s181_s6 = sshll.u32 %s758_s5, 4  ;;  %s182_s6 = int_to_ptr.vmem [resolvable:$true] %s181_s6 }
  0x15   : > { %p647_p0 = scmp.ne.s32.totalorder %s955_s2, %s646_s10  ;;  %p653_p5 = scmp.lt.u32.totalorder %s646_s10, %s955_s2 }
  0x16   : > { %p864_p13 = pnand %p856_p11, %p573_p12 }
  0x18   : > { %p648_p1 = pneg %p864_p13 }
  0x1a   : > { %p649_p2 = pnand %p648_p1, %p647_p0 }
  0x1c   : > { %p650_p3 = pneg %p649_p2 }
  0x1e   : > { %p655_p6 = pnand %p653_p5, %p650_p3 }
  0x20   : > { %658 = shalt.err (!%p655_p6)
}
  0x21   : > { %s659_s21 = scalar_lea.vmem %s182_s6, 512  ;;  %p667_p8 = scmp.lt.s32.totalorder %s182_s6, %s182_s6 }
  0x22   : > { %p660_p7 = scmp.ne.s32.totalorder %s182_s6, %s659_s21  ;;  %p668_p4 = scmp.lt.s32.totalorder %s659_s21, %s659_s21 }
  0x24   : > { %p662_p9 = pnand %p660_p7, %p648_p1  ;;  %p669_p11 = por %p668_p4, %p667_p8 }
  0x26   : > { %p663_p12 = pneg %p662_p9 }
  0x28   : > { %p670_p10 = pnand %p669_p11, %p663_p12 }
  0x2a   : > { %673 = shalt.err (!%p670_p10)
}
  0x2b   : > { %s759_s22 = smov 128   ;;  %s760_s24 = smov 8  }
  0x2c   : > { %576 = dma.hbm_to_vmem [thread:$0]  (!%p864_p13), %s955_s2, 512, %s182_s6, [#allocation4], %s759_s22, %s759_s22, %s760_s24  }
  0x2d   : > { %p967_p0 = scmp.ne.s32.totalorder %s964_s29, 0 }
  0x2e   : > { %p968_p2 = scmp.ne.s32.totalorder (!%p967_p0), %s965_s30, 0 }
  0x2f   : > { %217 = sbr.rel (%p967_p0) target bundleno = 665 (0x299), region = 36 }
  0x36   : > { %727 = dma.done.wait (%p968_p2), [#allocation4], 512  }
  0x37   : > { %729 = vsyncadd (%p968_p2), [#allocation4], 4294966784  ;;  %p249_p4 = scmp.lt.s32.totalorder %s748_s18, 1  ;;  %v761_v0 = vmov 0   ;;  %s762_s30 = smov 112   ;;  %vm273_vm0 = vcmask 64512   ;;  %v270_v5 = vlaneseq }
  0x38   : > { %645 = vset.pattern.permute.xlu0 %v761_v0  ;;  %s763_s13 = smov 120   ;;  %s764_s14 = smov 104   ;;  %v321_v6 = vld [vmem:[#allocation3] sm:$0xff]  ;;  %v322_v7 = vld [vmem:[#allocation3 + $0x8] sm:$0xff]  ;;  %v765_v9 = vmov 0.0|0.0   ;;  %v323_v10 = vld [vmem:[#allocation3 + $0x10] sm:$0xff] }
  0x39   : > { %s250_s8 = scalar_select %p249_p4, %s748_s18, 1  ;;  %v562_v8 = vpack.c.bf16 %v322_v7, %v321_v6  ;;  %561 = vmatprep.subr.bf16.mxu0 %v765_v9  ;;  %v324_v11 = vld [vmem:[#allocation3 + $0x18] sm:$0xff]  ;;  %v271_v12 = vshrl.u32 %v270_v5, 7  ;;  %vm766_vm1 = vmmov 0   ;;  %v767_v14 = vmov 0.0  }
  0x3a   : > { %v565_v13 = vpack.c.bf16 %v324_v11, %v323_v10  ;;  %558 = vmatprep.mubr.msk.f32.mxu0 %vm766_vm1, %v767_v14  ;;  %s768_s21 = smov 16   ;;  %s769_s22 = smov 8   ;;  %vm288_vm5 = vcmask 130112   ;;  %vm303_vm6 = vcmask 195712   ;;  %vm318_vm7 = vcmask 261312  }
  0x3b   : > { %s537_s7 = sshll.u32 %s250_s8, 3  ;;  %563 = vmatpush3.bf16.msra.mxu0 %v562_v8  ;;  %vm297_vm2 = vcmp.lt.s32.totalorder %v271_v12, 7  ;;  %vm282_vm3 = vcmp.ge.s32.totalorder %v271_v12, 1  ;;  %vm312_vm4 = vcmp.ge.s32.totalorder %v271_v12, 2  ;;  %s770_s24 = smov 24   ;;  %vm332_vm8 = vcmask 261120  }
  0x3c   : > { %s256_s6 = scalar_lea.vmem %s954_s1, %s537_s7  ;;  %s252_s12 = scalar_lea.vmem %s953_s0, %s537_s7  ;;  %564 = vmatprep.subr.bf16.mxu0 %v765_v9  ;;  %v539_v28 = vld [vmem:[%s956_s3] ss:$0 sm:$0xff] }
  0x3d   : > { %v264_v1 = vld [vmem:[%s256_s6] sm:$0xff]  ;;  %s246_s26 = sand.u32 1, %s740_s16   ;;  %s542_s9 = sshll.u32 %s748_s18, 7 }
  0x3e   : > { %267 = vperm.xlu0 %645, %v264_v1   ;;  %v272_v2 = vld [vmem:[%s252_s12] sm:$0xff]  ;;  %s536_s5 = sshll.u32 %s246_s26, 3  ;;  %s906_s12 = scalar_lea.hbm %s957_s4, %s542_s9 }
  0x3f   : > { %274 = vst.msk [vmem:[#allocation2] sm:$0xff] %vm273_vm0, %v272_v2  ;;  %566 = vmatpush3.bf16.msra.mxu0 %v565_v13  ;;  %s248_s10 = scalar_lea.vmem [#allocation6], %s536_s5  ;;  %p969_p10 = scmp.ne.s32.totalorder %s962_s25, 0 }
  0x40   : > { %s422_s6 = sshll.u32 %s248_s10, 4  ;;  %s771_s18 = smov [#allocation6]   ;;  %s908_s6 = int_to_ptr.vmem [resolvable:$true] %s422_s6 }
  0xbd   : > { %v268_v3 = vpop.permute.xlu0 %267 }
  0xbe   : > { %v276_v4 = vmul.f32 %v272_v2, %v268_v3 }
  0xc0   : > { %293 = vrot.lane.b32.xlu1 %v276_v4, %s762_s30  ;;  %278 = vrot.lane.b32.xlu0 %v276_v4, %s763_s13  ;;  %s408_s30 = scalar_lea.sflag [#allocation5], %s246_s26  ;;  %s674_s13 = scalar_lea.vmem %s908_s6, 128 }
  0xc1   : > { %p675_p8 = scmp.ne.s32.totalorder %s908_s6, %s674_s13 }
  0xc3   : > { %p676_p11 = pnand %p675_p8, %p969_p10 }
  0xc4   : > { %308 = vrot.lane.b32.xlu1 %v276_v4, %s764_s14  ;;  %s678_s14 = sshll.u32 %s771_s18, 4  ;;  %s679_s14 = int_to_ptr.vmem [resolvable:$false] %s678_s14 }
  0xc5   : > { %p677_p13 = pneg %p676_p11  ;;  %p681_p1 = scmp.lt.s32.totalorder %s908_s6, %s679_s14 }
 0x132   : > { %v294_v15 = vpop.permute.xlu1 %293  ;;  %v279_v16 = vpop.permute.xlu0 %278 }
 0x133   : > { %v296_v17 = vrot.slane %v294_v15, 1  ;;  %v281_v18 = vrot.slane %v279_v16, 7 }
 0x135   : > { %v298_v19 = vsel %vm297_vm2, %v296_v17, 0.0  ;;  %v283_v20 = vsel %vm282_vm3, %v281_v18, 0.0 }
 0x136   : > { %300 = vrot.lane.b32.xlu1 %v298_v19, %s768_s21  ;;  %v309_v21 = vpop.permute.xlu1 %308  ;;  %285 = vrot.lane.b32.xlu0 %v283_v20, %s769_s22  ;;  %s680_s21 = scalar_lea.vmem %s679_s14, 256 }
 0x137   : > { %v311_v22 = vrot.slane %v309_v21, 6  ;;  %p682_p3 = scmp.lt.s32.totalorder %s680_s21, %s674_s13 }
 0x139   : > { %v313_v23 = vsel %vm312_vm4, %v311_v22, 0.0  ;;  %p683_p5 = por %p682_p3, %p681_p1 }
 0x13a   : > { %315 = vrot.lane.b32.xlu0 %v313_v23, %s770_s24 }
 0x13b   : > { %p684_p6 = pnand %p683_p5, %p677_p13 }
 0x1a8   : > { %v301_v24 = vpop.permute.xlu1 %300  ;;  %v286_v25 = vpop.permute.xlu0 %285 }
 0x1a9   : > { %289 = vst.msk [vmem:[#allocation2] sm:$0xff] %vm288_vm5, %v286_v25 }
 0x1aa   : > { %304 = vst.msk [vmem:[#allocation2] sm:$0xff] %vm303_vm6, %v301_v24 }
 0x1ac   : > { %v316_v26 = vpop.permute.xlu0 %315 }
 0x1ad   : > { %319 = vst.msk [vmem:[#allocation2] sm:$0xff] %vm318_vm7, %v316_v26 }
 0x1b4   : > { %v320_v27 = vld [vmem:[#allocation2] sm:$0xff] }
 0x1b5   : > { %559 = vmatmul.mubr.msk.f32.vlgmr.msra.gmra.mrb[0].mxu0 %vm332_vm8, %v320_v27 }
 0x288   : > { %v402_v29 = vpop.f32.mrb[0].mxu0 }
 0x289   : > { %v403_v30 = vadd.f32 %v539_v28, %v402_v29  ;;  %v560_v31 = vpop.f32.mrb[1].mxu0 }
 0x28b   : > { %406 = vst.msk [vmem:[%s248_s10] sm:$0xff] %vm332_vm8, %v403_v30 }
 0x28c   : > { %687 = shalt.err (!%p684_p6)
}
 0x28d   : > { %s688_s22 = scalar_lea.hbm %s906_s12, 128  ;;  %s692_s5 = scalar_lea.hbm %s957_s4, 256 }
 0x28e   : > { %p689_p7 = scmp.ne.s32.totalorder %s906_s12, %s688_s22  ;;  %p693_p0 = scmp.lt.u32.totalorder %s906_s12, %s957_s4 }
 0x28f   : > { %p694_p2 = scmp.lt.u32.totalorder %s692_s5, %s688_s22  ;;  %p696_p8 = scmp.lt.u32.totalorder %s688_s22, %s906_s12 }
 0x290   : > { %p690_p9 = pnand %p689_p7, %p969_p10 }
 0x291   : > { %p695_p4 = por %p694_p2, %p693_p0 }
 0x292   : > { %p691_p12 = pneg %p690_p9 }
 0x293   : > { %p697_p11 = por %p696_p8, %p695_p4 }
 0x295   : > { %p698_p13 = pnand %p697_p11, %p691_p12 }
 0x297   : > { %701 = shalt.err (!%p698_p13)
}
 0x298   : > { %571 = dma.vmem_to_hbm [thread:$0]  (%p969_p10), %s908_s6, 128, %s906_s12, %s408_s30  }
 0x299 PF: > { %p583_p1 = scmp.ge.s32.totalorder %s756_s20, 2  ;;  %s434_s9 = sand.u32 1, %s736_s15  }
 0x29a   : > { %p970_p3 = scmp.ne.s32.totalorder %s963_s27, 0  ;;  %s435_s10 = scalar_lea.sflag [#allocation5], %s434_s9 }
 0x29c   : > { %p578_p5 = pnand %p583_p1, %p970_p3 }
 0x29e   : > { %731 = dma.done.wait (!%p578_p5), %s435_s10, 128  }
 0x29f   : > { %733 = vsyncadd (!%p578_p5), %s435_s10, 4294967168  ;;  %s18_s20 = sadd.s32 1, %s756_s20   ;;  %s971_s15 = smov %s740_s16 }
 0x2a0   : > { %p15_p6 = scmp.ge.s32.totalorder %s18_s20, 4   ;;  %s972_s16 = smov %s744_s17 }
 0x2a1   : > { %s973_s17 = smov %s850_s28  ;;  %s974_s18 = smov %s752_s19 }
 0x2a2   : > { %s975_s19 = smov %s977_s23  ;;  %17 = sbr.rel (!%p15_p6) target bundleno = 5 (0x5), region = 87 }
 0x2a9   :  { %440 = vsyncpa [#allocation4], 1 }
 0x2aa   :  { %442 = vsyncpa [#allocation4 + $0x1], 1 }
 0x2ab   :  { %443 = vsyncpa [#allocation5], 1 }
 0x2ac   :  { %445 = vsyncpa [#allocation5 + $0x1], 1 }

</bundles_post_ra>
